<compile_context>
chip_gen: v6e
topology: v6e:2x2x1
jax: 0.10.0
libtpu: 0.0.40
codegen_flags: <defaults>
</compile_context>

<pallas_src>
import functools

import jax
import jax.numpy as jnp
from jax.experimental import pallas as pl
from jax.experimental.pallas import tpu as pltpu

_LANE = 128


def _round_up(x, m):
    return (x + m - 1) // m * m


def _mlp_kernel(x_ref, w1_ref, b1_ref, w2_ref, b2_ref, o_ref):
    # fc1: bf16 @ bf16 -> f32 accumulate on the MXU; bias + ReLU in f32 on VPU.
    h = jnp.dot(x_ref[...], w1_ref[...], preferred_element_type=jnp.float32)
    h = jnp.maximum(h + b1_ref[...], 0.0)
    # fc2: cast the activation to bf16 for the MXU, accumulate in f32.
    o = jnp.dot(h.astype(jnp.bfloat16), w2_ref[...],
                preferred_element_type=jnp.float32)
    o_ref[...] = (o + b2_ref[...]).astype(o_ref.dtype)


@functools.partial(jax.jit, static_argnames=("batch_tile",))
def _mlp_forward_padded(xp, w1p, b1p, w2p, b2p, *, batch_tile):
    """Gridded pallas_call on lane-dense (padded) operands."""
    Bp, D_in = xp.shape
    Hp = w1p.shape[1]
    Dp = w2p.shape[1]

    cost = pl.CostEstimate(
        flops=2 * Bp * (D_in * Hp + Hp * Dp),
        transcendentals=0,
        bytes_accessed=(xp.size * 2 + w1p.size * 2 + w2p.size * 2
                        + b1p.size * 4 + b2p.size * 4 + Bp * Dp * 4),
    )

    return pl.pallas_call(
        _mlp_kernel,
        out_shape=jax.ShapeDtypeStruct((Bp, Dp), jnp.float32),
        grid_spec=pltpu.PrefetchScalarGridSpec(
            num_scalar_prefetch=0,
            grid=(Bp // batch_tile,),
            in_specs=[
                # batch tile of activations
                pl.BlockSpec((batch_tile, D_in), lambda i: (i, 0)),
                # weights / biases: constant block index -> VMEM-resident,
                # no per-tile re-DMA.
                pl.BlockSpec((D_in, Hp), lambda i: (0, 0)),
                pl.BlockSpec((1, Hp), lambda i: (0, 0)),
                pl.BlockSpec((Hp, Dp), lambda i: (0, 0)),
                pl.BlockSpec((1, Dp), lambda i: (0, 0)),
            ],
            out_specs=pl.BlockSpec((batch_tile, Dp), lambda i: (i, 0)),
        ),
        compiler_params=pltpu.CompilerParams(
            dimension_semantics=("parallel",)),
        cost_estimate=cost,
    )(xp, w1p, b1p, w2p, b2p)


def verbose_execution_forward(x, w1, b1, w2, b2, *, batch_tile=128, verbose=True):
    """Pallas equivalent of VerboseExecution(model)(x) for the synthetic MLP."""
    B, D_in = x.shape
    H = w1.shape[1]
    D_out = w2.shape[1]

    # Lane-dense padding: feature dims up to 128 lanes, batch up to a tile
    # multiple.  Zero padding is exact for this MLP (relu(0+0)=0, 0@W=0).
    Hp = _round_up(H, _LANE)
    Dp = _round_up(D_out, _LANE)
    Bp = _round_up(B, batch_tile)

    xp = jnp.zeros((Bp, D_in), jnp.bfloat16).at[:B].set(x.astype(jnp.bfloat16))
    w1p = jnp.zeros((D_in, Hp), jnp.bfloat16).at[:, :H].set(w1.astype(jnp.bfloat16))
    b1p = jnp.zeros((1, Hp), jnp.float32).at[:, :H].set(b1.astype(jnp.float32))
    w2p = jnp.zeros((Hp, Dp), jnp.bfloat16).at[:H, :D_out].set(w2.astype(jnp.bfloat16))
    b2p = jnp.zeros((1, Dp), jnp.float32).at[:, :D_out].set(b2.astype(jnp.float32))

    yp = _mlp_forward_padded(xp, w1p, b1p, w2p, b2p, batch_tile=batch_tile)
    y = yp[:B, :D_out]

    if verbose:
        # Emulates the registered forward hooks: f"{layer.__name__}: {output.shape}"
        # (output shapes are static; the fc1/relu activation never leaves VMEM).
        print(f"fc1: {(B, H)}")
        print(f"relu: {(B, H)}")
        print(f"fc2: {(B, D_out)}")

    return y


if __name__ == "__main__":
    # Batch chosen as a multiple of the 128-row batch tile (and of 16 for clean
    # bf16 sublane packing); feature dims match the synthetic wrapped model.
    B, D_in, Hdim, D_out = 256, 32, 64, 16

    key = jax.random.PRNGKey(0)
    kx, k1, k2, k3, k4 = jax.random.split(key, 5)

    x = jax.random.normal(kx, (B, D_in), dtype=jnp.float32)
    w1 = jax.random.normal(k1, (D_in, Hdim), dtype=jnp.float32) * 0.1
    b1 = jax.random.normal(k2, (1, Hdim), dtype=jnp.float32) * 0.1
    w2 = jax.random.normal(k3, (Hdim, D_out), dtype=jnp.float32) * 0.1
    b2 = jax.random.normal(k4, (1, D_out), dtype=jnp.float32) * 0.1

    y = verbose_execution_forward(x, w1, b1, w2, b2, verbose=True)
    jax.block_until_ready(y)

    # Pure-JAX reference check of the wrapped model's forward pass.
    # Tolerance loosened for bf16 MXU operands.
    ref = jnp.maximum(x @ w1 + b1, 0.0) @ w2 + b2
    assert jnp.allclose(y, ref, atol=3e-2, rtol=3e-2), "mismatch vs reference"

    print("KERNEL_OK")
</pallas_src>

<mosaic_0001>
module attributes {stable_mosaic.version = 11 : i64} {
  func.func @_mlp_kernel(%arg0: i32, %arg1: memref<128x32xbf16, #tpu.memory_space<vmem>>, %arg2: memref<32x128xbf16, #tpu.memory_space<vmem>>, %arg3: memref<1x128xf32, #tpu.memory_space<vmem>>, %arg4: memref<128x128xbf16, #tpu.memory_space<vmem>>, %arg5: memref<1x128xf32, #tpu.memory_space<vmem>>, %arg6: memref<128x128xf32, #tpu.memory_space<vmem>>) attributes {dimension_semantics = [#tpu.dimension_semantics<parallel>], iteration_bounds = array<i64: 2>, scalar_prefetch = 0 : i64, scratch_operands = 0 : i64, tpu.core_type = #tpu.core_type<tc>, window_params = [{transform_indices = @transform_0, window_bounds = array<i64: 128, 32>}, {pipeline_mode = #tpu.pipeline_mode<synchronous>, transform_indices = @transform_1, window_bounds = array<i64: 32, 128>}, {pipeline_mode = #tpu.pipeline_mode<synchronous>, transform_indices = @transform_2, window_bounds = array<i64: 1, 128>}, {pipeline_mode = #tpu.pipeline_mode<synchronous>, transform_indices = @transform_3, window_bounds = array<i64: 128, 128>}, {pipeline_mode = #tpu.pipeline_mode<synchronous>, transform_indices = @transform_4, window_bounds = array<i64: 1, 128>}, {transform_indices = @transform_5, window_bounds = array<i64: 128, 128>}]} {
    %c0 = arith.constant 0 : index
    %c0_0 = arith.constant 0 : index
    %0 = vector.load %arg1[%c0, %c0_0] : memref<128x32xbf16, #tpu.memory_space<vmem>>, vector<128x32xbf16>
    %c0_1 = arith.constant 0 : index
    %c0_2 = arith.constant 0 : index
    %1 = vector.load %arg2[%c0_1, %c0_2] : memref<32x128xbf16, #tpu.memory_space<vmem>>, vector<32x128xbf16>
    %cst = arith.constant dense<0.000000e+00> : vector<128x128xf32>
    %2 = tpu.matmul %0, %1, %cst {dimension_numbers = #tpu.dot_dimension_numbers<[1], [0], [0], [1], [0, 0, 1, 1], [], []>} : vector<128x32xbf16>, vector<32x128xbf16>, vector<128x128xf32> -> vector<128x128xf32>
    %c0_3 = arith.constant 0 : index
    %c0_4 = arith.constant 0 : index
    %3 = vector.load %arg3[%c0_3, %c0_4] : memref<1x128xf32, #tpu.memory_space<vmem>>, vector<1x128xf32>
    %4 = vector.broadcast %3 : vector<1x128xf32> to vector<128x128xf32>
    %5 = arith.addf %2, %4 : vector<128x128xf32>
    %cst_5 = arith.constant 0.000000e+00 : f32
    %6 = vector.broadcast %cst_5 : f32 to vector<128x128xf32>
    %7 = arith.maximumf %5, %6 : vector<128x128xf32>
    %8 = arith.truncf %7 : vector<128x128xf32> to vector<128x128xbf16>
    %c0_6 = arith.constant 0 : index
    %c0_7 = arith.constant 0 : index
    %9 = vector.load %arg4[%c0_6, %c0_7] : memref<128x128xbf16, #tpu.memory_space<vmem>>, vector<128x128xbf16>
    %cst_8 = arith.constant dense<0.000000e+00> : vector<128x128xf32>
    %10 = tpu.matmul %8, %9, %cst_8 {dimension_numbers = #tpu.dot_dimension_numbers<[1], [0], [0], [1], [0, 0, 1, 1], [], []>} : vector<128x128xbf16>, vector<128x128xbf16>, vector<128x128xf32> -> vector<128x128xf32>
    %c0_9 = arith.constant 0 : index
    %c0_10 = arith.constant 0 : index
    %11 = vector.load %arg5[%c0_9, %c0_10] : memref<1x128xf32, #tpu.memory_space<vmem>>, vector<1x128xf32>
    %12 = vector.broadcast %11 : vector<1x128xf32> to vector<128x128xf32>
    %13 = arith.addf %10, %12 : vector<128x128xf32>
    %c0_11 = arith.constant 0 : index
    %c0_12 = arith.constant 0 : index
    %14 = vector.load %arg6[%c0_11, %c0_12] : memref<128x128xf32, #tpu.memory_space<vmem>>, vector<128x128xf32>
    tpu.vector_store %arg6[%c0_11, %c0_12], %13 {strides = array<i32>} : memref<128x128xf32, #tpu.memory_space<vmem>>, vector<128x128xf32>,
    return
  }
  func.func @transform_0(%arg0: i32) -> (i32, i32) {
    %c0_i32 = arith.constant 0 : i32
    %c0_i32_0 = arith.constant 0 : i32
    return %arg0, %c0_i32 : i32, i32
  }
  func.func @transform_1(%arg0: i32) -> (i32, i32) {
    %c0_i32 = arith.constant 0 : i32
    %c0_i32_0 = arith.constant 0 : i32
    %c0_i32_1 = arith.constant 0 : i32
    return %c0_i32, %c0_i32_0 : i32, i32
  }
  func.func @transform_2(%arg0: i32) -> (i32, i32) {
    %c0_i32 = arith.constant 0 : i32
    %c0_i32_0 = arith.constant 0 : i32
    %c0_i32_1 = arith.constant 0 : i32
    return %c0_i32, %c0_i32_0 : i32, i32
  }
  func.func @transform_3(%arg0: i32) -> (i32, i32) {
    %c0_i32 = arith.constant 0 : i32
    %c0_i32_0 = arith.constant 0 : i32
    %c0_i32_1 = arith.constant 0 : i32
    return %c0_i32, %c0_i32_0 : i32, i32
  }
  func.func @transform_4(%arg0: i32) -> (i32, i32) {
    %c0_i32 = arith.constant 0 : i32
    %c0_i32_0 = arith.constant 0 : i32
    %c0_i32_1 = arith.constant 0 : i32
    return %c0_i32, %c0_i32_0 : i32, i32
  }
  func.func @transform_5(%arg0: i32) -> (i32, i32) {
    %c0_i32 = arith.constant 0 : i32
    %c0_i32_0 = arith.constant 0 : i32
    return %arg0, %c0_i32 : i32, i32
  }
}

</mosaic_0001>

<bundles_post_ra>
// kernel: _mlp_forward_padded.1
= control target key start
LH: loop header
LB: loop body
LE: loop exit
PB: predicated region body
PF: predicated region fallthrough
CT: control target
= control target key end

     0   :  { %10 = vsyncpa [#allocation3], 0  ;;  %s1179_s0 = inlined_call_operand.vmem [shape: bf16[256,32], index: 0, kind: input, shape index: {}]   ;;  %s1180_s1 = inlined_call_operand.vmem [shape: bf16[32,128], index: 1, kind: input, shape index: {}]   ;;  %s1181_s2 = inlined_call_operand.vmem [shape: f32[1,128], index: 2, kind: input, shape index: {}]   ;;  %s1182_s3 = inlined_call_operand.vmem [shape: bf16[128,128], index: 3, kind: input, shape index: {}]   ;;  %s1183_s4 = inlined_call_operand.vmem [shape: f32[1,128], index: 4, kind: input, shape index: {}]   ;;  %s1184_s5 = inlined_call_operand.hbm [shape: f32[256,128], index: 5, kind: output, shape index: {}]  }
   0x1   :  { %12 = vsyncpa [#allocation3 + $0x1], 0  ;;  %s1001_s18 = smov 0   ;;  %s1003_s19 = smov 0  }
   0x2   :  { %s1005_s20 = smov 0   ;;  %s1007_s21 = smov 0  }
   0x3 LB: > { %s1022_s22 = sadd.s32 4294967295, %s966_s21   ;;  %s712_s23 = sadd.s32 4294967294, %s966_s21   ;;  %s966_s21 = sphi %s1007_s21, %s1190_s21   ;;  %s962_s20 = sphi %s1005_s20, %s1189_s20   ;;  %s958_s19 = sphi %s1003_s19, %s1188_s19   ;;  %s954_s18 = sphi %s1001_s18, %s1187_s18  }
   0x4   : > { %s1026_s24 = sadd.s32 1, %s966_s21   ;;  %s135_s25 = sadd.s32 1, %s962_s20 }
   0x5   : > { %s132_s26 = ssub.s32 %s966_s21, %s1026_s24  ;;  %p145_p0 = scmp.ne.s32.totalorder %s962_s20, %s958_s19 }
   0x6   : > { %p133_p1 = scmp.eq.s32.totalorder %s132_s26, 0  ;;  %p146_p2 = scmp.eq.s32.totalorder %s1022_s22, 1 }
   0x7   : > { %p151_p3 = scmp.ne.s32.totalorder %s958_s19, %s954_s18  ;;  %p152_p4 = scmp.eq.s32.totalorder %s712_s23, 1 }
   0x8   : > { %s1037_s27 = scalar_select %p133_p1, %s962_s20, %s135_s25  }
   0x9   : > { %p1039_p5 = por %p146_p2, %p145_p0  ;;  %p1043_p6 = por %p152_p4, %p151_p3 }
   0xa   : > { %p715_p7 = scmp.ge.s32.totalorder %s966_s21, 1  ;;  %p191_p8 = scmp.lt.s32.totalorder %s966_s21, 3 }
   0xc   : > { %p192_p9 = pnand %p715_p7, %p191_p8 }
   0xd   : > { %s717_s7 = sshll.u32 (!%p192_p9), %s1022_s22, 4  ;;  %s216_s16 = sand.u32 (!%p192_p9), 1, %s958_s19  }
   0xe   : > { %195 = sbr.rel (%p192_p9) target bundleno = 473 (0x1d9), region = 40  ;;  %p220_p10 = scmp.lt.s32.totalorder (!%p192_p9), %s717_s7, 31 }
   0xf   : > { %s752_s30 = sshll.u32 (!%p192_p9), %s1022_s22, 11  ;;  %s1139_s22 = scalar_lea.sflag (!%p192_p9), [#allocation3], %s216_s16 }
  0x10   : > { %s1131_s9 = scalar_lea.hbm (!%p192_p9), %s1184_s5, %s752_s30  ;;  %s968_s11 = smov (!%p192_p9), [#allocation2]  }
  0x11   : > { %s910_s12 = sshll.u32 (!%p192_p9), %s968_s11, 4  ;;  %s911_s12 = int_to_ptr.vmem [resolvable:$false] %s910_s12 }
  0x12   : > { %s912_s13 = scalar_lea.vmem (!%p192_p9), %s911_s12, 4096 }
  0x13   : > { %v888_v0 = vld [vmem:[%s1180_s1 + $0x8] sm:$0xff]   ;;  %v889_v1 = vld [vmem:[%s1180_s1] sm:$0xff]   ;;  %v898_v2 = vld [vmem:[%s1182_s3 + $0x38] sm:$0xff]   ;;  %s1192_s7 = smov (!%p220_p10, %s717_s7), 31  ;;  %vm306_vm0 = vcmask 261120  }
  0x14   : > { %779 = vmatprep.subr.bf16.mxu0 %v888_v0  ;;  %v899_v3 = vld [vmem:[%s1182_s3 + $0x30] sm:$0xff]   ;;  %831 = vmatprep.subr.bf16.mxu1 %v898_v2  ;;  %s718_s14 = sshll.u32 %s1192_s7, 2  ;;  %v900_v4 = vld [vmem:[%s1182_s3 + $0x28] sm:$0xff]   ;;  %v901_v8 = vld [vmem:[%s1182_s3 + $0x20] sm:$0xff]  }
  0x15   : > { %780 = vmatpush3.bf16.msra.mxu0 %v888_v0  ;;  %839 = vmatpush3.bf16.msra.mxu1 %v898_v2  ;;  %s1065_s17 = scalar_lea.vmem %s1179_s0, %s718_s14  ;;  %v902_v11 = vld [vmem:[%s1182_s3 + $0x18] sm:$0xff]   ;;  %v903_v15 = vld [vmem:[%s1182_s3 + $0x10] sm:$0xff]   ;;  %v904_v16 = vld [vmem:[%s1182_s3 + $0x8] sm:$0xff]  }
  0x16   : > { %781 = vmatprep.subr.bf16.mxu0 %v889_v1  ;;  %832 = vmatprep.subr.bf16.mxu1 %v899_v3  ;;  %v890_v5 = vld [vmem:[%s1065_s17] sm:$0xff]   ;;  %v891_v6 = vld [vmem:[%s1065_s17 + $0x8] sm:$0xff]   ;;  %v892_v7 = vld [vmem:[%s1065_s17 + $0x10] sm:$0xff]  }
  0x17   : > { %783 = vmatprep.mubr.msk.bf16.mxu0 %vm306_vm0, %v890_v5  ;;  %v893_v9 = vld [vmem:[%s1065_s17 + $0x18] sm:$0xff]   ;;  %v894_v10 = vld [vmem:[%s1065_s17 + $0x20] sm:$0xff]   ;;  %v895_v12 = vld [vmem:[%s1065_s17 + $0x28] sm:$0xff]  }
  0x18   : > { %v896_v13 = vld [vmem:[%s1065_s17 + $0x30] sm:$0xff]   ;;  %v897_v14 = vld [vmem:[%s1065_s17 + $0x38] sm:$0xff]   ;;  %v905_v17 = vld [vmem:[%s1182_s3] sm:$0xff]   ;;  %s716_s17 = sshll.u32 %s216_s16, 7 }
  0x19   : > { %782 = vmatpush3.bf16.msra.mxu0 %v889_v1  ;;  %840 = vmatpush3.bf16.msra.mxu1 %v899_v3  ;;  %v719_v20 = vld [vmem:[%s1181_s2] ss:$0 sm:$0xff]  ;;  %s1110_s26 = scalar_lea.vmem [#allocation2], %s716_s17 }
  0x1a   : > { %799 = vmatprep.subr.bf16.mxu0 %v898_v2  ;;  %833 = vmatprep.subr.bf16.mxu1 %v900_v4  ;;  %s650_s6 = sshll.u32 %s1110_s26, 4  ;;  %s1133_s6 = int_to_ptr.vmem [resolvable:$true] %s650_s6 }
  0x1b   : > { %s906_s10 = scalar_lea.vmem %s1133_s6, 2048  ;;  %p913_p0 = scmp.lt.s32.totalorder %s1133_s6, %s911_s12 }
  0x1c   : > { %784 = vmatmul.mubr.msk.bf16.vlgmr.msra.gmra.mxu0 %vm306_vm0, %v891_v6  ;;  %p907_p11 = scmp.ne.s32.totalorder %s1133_s6, %s906_s10  ;;  %p914_p1 = scmp.lt.s32.totalorder %s912_s13, %s906_s10 }
  0x1d   : > { %787 = vmatprep.mubr.msk.bf16.mxu0 %vm306_vm0, %v892_v7  ;;  %800 = vmatpush3.bf16.msra.mxu0 %v898_v2 }
  0x1e   : > { %801 = vmatprep.subr.bf16.mxu0 %v899_v3  ;;  %841 = vmatpush3.bf16.msra.mxu1 %v900_v4  ;;  %p908_p12 = pnand %p907_p11, %p1039_p5  ;;  %p915_p2 = por %p914_p1, %p913_p0 }
  0x1f   : > { %834 = vmatprep.subr.bf16.mxu1 %v901_v8 }
  0x20   : > { %p909_p13 = pneg %p908_p12 }
  0x21   : > { %802 = vmatpush3.bf16.msra.mxu0 %v899_v3 }
  0x22   : > { %803 = vmatprep.subr.bf16.mxu0 %v900_v4  ;;  %842 = vmatpush3.bf16.msra.mxu1 %v901_v8  ;;  %p916_p3 = pnand %p915_p2, %p909_p13 }
  0x23   : > { %835 = vmatprep.subr.bf16.mxu1 %v902_v11 }
  0x24   : > { %788 = vmatmul.mubr.msk.bf16.gmra.mxu0 %vm306_vm0, %v893_v9 }
  0x25   : > { %791 = vmatprep.mubr.msk.bf16.mxu0 %vm306_vm0, %v894_v10  ;;  %804 = vmatpush3.bf16.msra.mxu0 %v900_v4 }
  0x26   : > { %805 = vmatprep.subr.bf16.mxu0 %v901_v8  ;;  %843 = vmatpush3.bf16.msra.mxu1 %v902_v11 }
  0x27   : > { %836 = vmatprep.subr.bf16.mxu1 %v903_v15 }
  0x29   : > { %806 = vmatpush3.bf16.msra.mxu0 %v901_v8 }
  0x2a   : > { %807 = vmatprep.subr.bf16.mxu0 %v902_v11  ;;  %844 = vmatpush3.bf16.msra.mxu1 %v903_v15 }
  0x2b   : > { %837 = vmatprep.subr.bf16.mxu1 %v904_v16 }
  0x2c   : > { %792 = vmatmul.mubr.msk.bf16.gmra.mxu0 %vm306_vm0, %v895_v12 }
  0x2d   : > { %795 = vmatprep.mubr.msk.bf16.mxu0 %vm306_vm0, %v896_v13  ;;  %808 = vmatpush3.bf16.msra.mxu0 %v902_v11  ;;  %v738_v11 = vld [vmem:[%s1183_s4] ss:$0 sm:$0xff] }
  0x2e   : > { %809 = vmatprep.subr.bf16.mxu0 %v903_v15  ;;  %845 = vmatpush3.bf16.msra.mxu1 %v904_v16 }
  0x2f   : > { %838 = vmatprep.subr.bf16.mxu1 %v905_v17 }
  0x31   : > { %810 = vmatpush3.bf16.msra.mxu0 %v903_v15 }
  0x32   : > { %811 = vmatprep.subr.bf16.mxu0 %v904_v16  ;;  %846 = vmatpush3.bf16.msra.mxu1 %v905_v17 }
  0x34   : > { %796 = vmatmul.mubr.msk.bf16.gmra.mxu0 %vm306_vm0, %v897_v14 }
  0x35   : > { %812 = vmatpush3.bf16.msra.mxu0 %v904_v16 }
  0x36   : > { %813 = vmatprep.subr.bf16.mxu0 %v905_v17 }
  0x39   : > { %814 = vmatpush3.bf16.msra.mxu0 %v905_v17 }
  0xdc   : > { %v785_v18 = vpop.f32.mrf.mxu0 }
  0xdd   : > { %v374_v24 = vadd.f32 %v785_v18, %v719_v20 }
  0xde   : > { %v365_v19 = vpop.f32.mrf.mxu0 }
  0xdf   : > { %v366_v22 = vadd.f32 %v719_v20, %v365_v19  ;;  %v430_v31 = vmax.f32 %v374_v24, 0.0 }
  0xe0   : > { %v786_v21 = vpop.f32.mrf.mxu0 }
  0xe1   : > { %v377_v23 = vadd.f32 %v786_v21, %v719_v20  ;;  %v428_v29 = vmax.f32 %v366_v22, 0.0 }
  0xe2   : > { %v368_v25 = vpop.f32.mrf.mxu0 }
  0xe3   : > { %v369_v26 = vadd.f32 %v719_v20, %v368_v25  ;;  %v431_v27 = vmax.f32 %v377_v23, 0.0 }
  0xe4   : > { %v789_v28 = vpop.f32.mrf.mxu0 }
  0xe5   : > { %v429_v30 = vmax.f32 %v369_v26, 0.0  ;;  %v445_v34 = vpack.c.bf16 %v431_v27, %v430_v31  ;;  %v390_v38 = vadd.f32 %v789_v28, %v719_v20 }
  0xe6   : > { %v381_v32 = vpop.f32.mrf.mxu0 }
  0xe7   : > { %v444_v33 = vpack.c.bf16 %v429_v30, %v428_v29  ;;  %v382_v36 = vadd.f32 %v719_v20, %v381_v32  ;;  %v434_v45 = vmax.f32 %v390_v38, 0.0 }
  0xe8   : > { %v790_v35 = vpop.f32.mrf.mxu0 }
  0xe9   : > { %v393_v37 = vadd.f32 %v790_v35, %v719_v20  ;;  %815 = vmatprep.mubr.bf16.mxu0 %v444_v33  ;;  %v432_v43 = vmax.f32 %v382_v36, 0.0 }
  0xea   : > { %v384_v39 = vpop.f32.mrf.mxu0  ;;  %816 = vmatmul.mubr.bf16.vlgmr.msra.gmra.mxu0 %v445_v34 }
  0xeb   : > { %v385_v40 = vadd.f32 %v719_v20, %v384_v39  ;;  %v435_v41 = vmax.f32 %v393_v37, 0.0 }
  0xec   : > { %v793_v42 = vpop.f32.mrf.mxu0 }
  0xed   : > { %v433_v44 = vmax.f32 %v385_v40, 0.0  ;;  %v447_v48 = vpack.c.bf16 %v435_v41, %v434_v45  ;;  %v406_v52 = vadd.f32 %v793_v42, %v719_v20 }
  0xee   : > { %v397_v46 = vpop.f32.mrf.mxu0 }
  0xef   : > { %v446_v47 = vpack.c.bf16 %v433_v44, %v432_v43  ;;  %v398_v50 = vadd.f32 %v719_v20, %v397_v46  ;;  %v438_v59 = vmax.f32 %v406_v52, 0.0 }
  0xf0   : > { %v794_v49 = vpop.f32.mrf.mxu0 }
  0xf1   : > { %v409_v51 = vadd.f32 %v794_v49, %v719_v20  ;;  %819 = vmatprep.mubr.bf16.mxu1 %v446_v47  ;;  %v436_v57 = vmax.f32 %v398_v50, 0.0 }
  0xf2   : > { %v400_v53 = vpop.f32.mrf.mxu0  ;;  %820 = vmatmul.mubr.bf16.vlgmr.msra.gmra.mxu1 %v447_v48 }
  0xf3   : > { %v401_v54 = vadd.f32 %v719_v20, %v400_v53  ;;  %v439_v55 = vmax.f32 %v409_v51, 0.0 }
  0xf4   : > { %v797_v56 = vpop.f32.mrf.mxu0 }
  0xf5   : > { %v437_v58 = vmax.f32 %v401_v54, 0.0  ;;  %v449_v62 = vpack.c.bf16 %v439_v55, %v438_v59  ;;  %v422_v2 = vadd.f32 %v797_v56, %v719_v20 }
  0xf6   : > { %v413_v60 = vpop.f32.mrf.mxu0 }
  0xf7   : > { %v448_v61 = vpack.c.bf16 %v437_v58, %v436_v57  ;;  %v414_v0 = vadd.f32 %v719_v20, %v413_v60  ;;  %v442_v8 = vmax.f32 %v422_v2, 0.0 }
  0xf8   : > { %v798_v63 = vpop.f32.mrf.mxu0 }
  0xf9   : > { %v425_v1 = vadd.f32 %v798_v63, %v719_v20  ;;  %823 = vmatprep.mubr.bf16.mxu1 %v448_v61  ;;  %v440_v6 = vmax.f32 %v414_v0, 0.0 }
  0xfa   : > { %v416_v3 = vpop.f32.mrf.mxu0  ;;  %824 = vmatmul.mubr.bf16.gmra.mxu1 %v449_v62 }
  0xfb   : > { %v417_v4 = vadd.f32 %v719_v20, %v416_v3  ;;  %v443_v5 = vmax.f32 %v425_v1, 0.0 }
  0xfd   : > { %v441_v7 = vmax.f32 %v417_v4, 0.0  ;;  %v451_v10 = vpack.c.bf16 %v443_v5, %v442_v8 }
  0xff   : > { %v450_v9 = vpack.c.bf16 %v441_v7, %v440_v6 }
 0x101   : > { %827 = vmatprep.mubr.bf16.mxu1 %v450_v9 }
 0x102   : > { %828 = vmatmul.mubr.bf16.gmra.mxu1 %v451_v10 }
 0x1aa   : > { %v817_v12 = vpop.f32.mrf.mxu0 }
 0x1ab   : > { %v566_v13 = vadd.f32 %v817_v12, %v738_v11 }
 0x1ac   : > { %v557_v14 = vpop.f32.mrf.mxu0 }
 0x1ad   : > { %622 = vst [vmem:[%s1110_s26 + $0x10] sm:$0xff] %v566_v13  ;;  %v558_v15 = vadd.f32 %v738_v11, %v557_v14 }
 0x1ae   : > { %v818_v16 = vpop.f32.mrf.mxu0 }
 0x1af   : > { %620 = vst [vmem:[%s1110_s26] sm:$0xff] %v558_v15  ;;  %v569_v17 = vadd.f32 %v818_v16, %v738_v11 }
 0x1b0   : > { %v560_v18 = vpop.f32.mrf.mxu0 }
 0x1b1   : > { %623 = vst [vmem:[%s1110_s26 + $0x18] sm:$0xff] %v569_v17  ;;  %v561_v19 = vadd.f32 %v738_v11, %v560_v18 }
 0x1b2   : > { %v821_v20 = vpop.f32.mrf.mxu1 }
 0x1b3   : > { %621 = vst [vmem:[%s1110_s26 + $0x8] sm:$0xff] %v561_v19  ;;  %v582_v21 = vadd.f32 %v821_v20, %v738_v11 }
 0x1b4   : > { %v573_v22 = vpop.f32.mrf.mxu1 }
 0x1b5   : > { %626 = vst [vmem:[%s1110_s26 + $0x30] sm:$0xff] %v582_v21  ;;  %v574_v23 = vadd.f32 %v738_v11, %v573_v22 }
 0x1b6   : > { %v822_v24 = vpop.f32.mrf.mxu1 }
 0x1b7   : > { %624 = vst [vmem:[%s1110_s26 + $0x20] sm:$0xff] %v574_v23  ;;  %v585_v25 = vadd.f32 %v822_v24, %v738_v11 }
 0x1b8   : > { %v576_v26 = vpop.f32.mrf.mxu1 }
 0x1b9   : > { %627 = vst [vmem:[%s1110_s26 + $0x38] sm:$0xff] %v585_v25  ;;  %v577_v27 = vadd.f32 %v738_v11, %v576_v26 }
 0x1ba   : > { %v825_v28 = vpop.f32.mrf.mxu1 }
 0x1bb   : > { %625 = vst [vmem:[%s1110_s26 + $0x28] sm:$0xff] %v577_v27  ;;  %v598_v29 = vadd.f32 %v825_v28, %v738_v11 }
 0x1bc   : > { %v589_v30 = vpop.f32.mrf.mxu1 }
 0x1bd   : > { %630 = vst [vmem:[%s1110_s26 + $0x50] sm:$0xff] %v598_v29  ;;  %v590_v31 = vadd.f32 %v738_v11, %v589_v30 }
 0x1be   : > { %v826_v32 = vpop.f32.mrf.mxu1 }
 0x1bf   : > { %628 = vst [vmem:[%s1110_s26 + $0x40] sm:$0xff] %v590_v31  ;;  %v601_v33 = vadd.f32 %v826_v32, %v738_v11 }
 0x1c0   : > { %v592_v34 = vpop.f32.mrf.mxu1 }
 0x1c1   : > { %631 = vst [vmem:[%s1110_s26 + $0x58] sm:$0xff] %v601_v33  ;;  %v593_v35 = vadd.f32 %v738_v11, %v592_v34 }
 0x1c2   : > { %v829_v36 = vpop.f32.mrf.mxu1 }
 0x1c3   : > { %629 = vst [vmem:[%s1110_s26 + $0x48] sm:$0xff] %v593_v35  ;;  %v614_v37 = vadd.f32 %v829_v36, %v738_v11 }
 0x1c4   : > { %v605_v38 = vpop.f32.mrf.mxu1 }
 0x1c5   : > { %634 = vst [vmem:[%s1110_s26 + $0x70] sm:$0xff] %v614_v37  ;;  %v606_v39 = vadd.f32 %v738_v11, %v605_v38 }
 0x1c6   : > { %v830_v40 = vpop.f32.mrf.mxu1 }
 0x1c7   : > { %632 = vst [vmem:[%s1110_s26 + $0x60] sm:$0xff] %v606_v39  ;;  %v617_v41 = vadd.f32 %v830_v40, %v738_v11 }
 0x1c8   : > { %v608_v42 = vpop.f32.mrf.mxu1 }
 0x1c9   : > { %635 = vst [vmem:[%s1110_s26 + $0x78] sm:$0xff] %v617_v41  ;;  %v609_v43 = vadd.f32 %v738_v11, %v608_v42 }
 0x1cb   : > { %633 = vst [vmem:[%s1110_s26 + $0x68] sm:$0xff] %v609_v43 }
 0x1cc   : > { %919 = shalt.err (!%p916_p3)
}
 0x1cd   : > { %s920_s14 = scalar_lea.hbm %s1131_s9, 2048  ;;  %s924_s17 = scalar_lea.hbm %s1184_s5, 4096 }
 0x1ce   : > { %p921_p4 = scmp.ne.s32.totalorder %s1131_s9, %s920_s14  ;;  %p925_p9 = scmp.lt.s32.totalorder %s1131_s9, %s1184_s5 }
 0x1cf   : > { %p926_p10 = scmp.lt.s32.totalorder %s924_s17, %s920_s14 }
 0x1d0   : > { %p922_p7 = pnand %p921_p4, %p1039_p5 }
 0x1d1   : > { %p927_p11 = por %p926_p10, %p925_p9 }
 0x1d2   : > { %p923_p8 = pneg %p922_p7 }
 0x1d4   : > { %p928_p12 = pnand %p927_p11, %p923_p8 }
 0x1d6   : > { %931 = shalt.err (!%p928_p12)
}
 0x1d7   : > { %s969_s26 = smov 128   ;;  %s970_s30 = smov 8  }
 0x1d8   : > { %847 = dma.vmem_to_hbm [thread:$0]  (%p1039_p5), %s1133_s6, 2048, %s1131_s9, %s1139_s22, %s969_s26, %s969_s26, %s970_s30  }
 0x1d9 PF: > { %p853_p13 = scmp.ge.s32.totalorder %s966_s21, 2  ;;  %s665_s7 = sand.u32 1, %s954_s18  }
 0x1da   : > { %s666_s8 = scalar_lea.sflag [#allocation3], %s665_s7 }
 0x1db   : > { %p850_p0 = pnand %p853_p13, %p1043_p6 }
 0x1dd   : > { %p851_p1 = pneg %p850_p0 }
 0x1df   : > { %949 = dma.done.wait (%p851_p1), %s666_s8, 2048  }
 0x1e0   : > { %951 = vsyncadd (%p851_p1), %s666_s8, 4294965248  ;;  %p15_p2 = scmp.ge.s32.totalorder %s1026_s24, 4   ;;  %s1187_s18 = smov %s958_s19 }
 0x1e1   : > { %s1188_s19 = smov %s962_s20  ;;  %s1189_s20 = smov %s1037_s27 }
 0x1e2   : > { %s1190_s21 = smov %s1026_s24  ;;  %17 = sbr.rel (!%p15_p2) target bundleno = 3 (0x3), region = 75 }
 0x1e7   :  { %671 = vsyncpa [#allocation3], 1 }
 0x1e8   :  { %673 = vsyncpa [#allocation3 + $0x1], 1 }

</bundles_post_ra>
